<compile_context>
chip_gen: v7x
topology: tpu7x:2x2x1
jax: 0.10.0
libtpu: 0.0.40
codegen_flags: <defaults>
</compile_context>

<pallas_src>
import jax
import jax.numpy as jnp
from jax.experimental import pallas as pl
from jax.experimental.pallas import tpu as pltpu


def _matmul_kernel(x_ref, w_ref, o_ref):
    # Per-step critical path is a single MXU matmul:
    #   (Bb, 2*in_dim) @ (2*in_dim, 2*out_pad) -> (Bb, 2*out_pad), f32 accum.
    o_ref[...] = jnp.dot(x_ref[...], w_ref[...],
                         preferred_element_type=jnp.float32)


def _round_up(n, m):
    return -(-n // m) * m


def _choose_block_b(B, in_features, out_width, max_block_b=512):
    """Pick the batch tile.

    - Small batch (< 256 rows): one full-batch step (block == full dim, so no
      (8,128) alignment constraint and no masked tail).
    - Large batch: tiles of up to max_block_b rows, but at least 2 grid steps
      (so v7x megacore has work for both TensorCores), rows a multiple of 8.
    - VMEM guardrail: double-buffered x/out tiles + 2x W must stay under the
      32 MiB scoped default (safe on v7x's 64 MiB physical VMEM).
    """
    max_block_b = max(8, max_block_b)
    if B < 256:
        return B
    Bb = min(max_block_b, _round_up(-(-B // 2), 8))
    bytes_per_row = 4 * (in_features + out_width)          # x row + out row (f32)
    w_bytes = 4 * in_features * out_width
    budget = (32 << 20) - 2 * w_bytes                      # 32 MiB scoped default
    max_rows = max(8, (budget // (2 * bytes_per_row)) // 8 * 8)
    return max(8, min(Bb, max_rows))


def phase_shifter_forward(x, theta, scale=1.0, max_block_b=512,
                          bf16_operands=False):
    """x: (B, in_features) f32 with in_features = 2*in_dim (real|imag halves).
       theta: (in_dim, out_features) f32. Returns (B, 2*out_features) f32."""
    B, in_features = x.shape
    in_dim, out_features = theta.shape
    assert in_features == 2 * in_dim

    # --- Build W once, outside the grid loop (tiny XLA op on theta) --------
    inv_scale = jnp.float32(1.0 / float(scale))
    c = jnp.cos(theta) * inv_scale                          # (in_dim, out)
    s = jnp.sin(theta) * inv_scale                          # (in_dim, out)
    w = jnp.concatenate(
        [jnp.concatenate([c, -s], axis=-1),                 # (in_dim, 2*out)
         jnp.concatenate([s, c], axis=-1)], axis=0)         # (2*in_dim, 2*out)

    out_width = 2 * out_features
    # Lane-density guard: keep the output last dim a multiple of 128 so
    # stores are unmasked. No-op when 2*out_features is already >= 128-aligned.
    out_pad = _round_up(out_width, 128)
    if out_pad != out_width:
        w = jnp.pad(w, ((0, 0), (0, out_pad - out_width)))

    x = x.astype(jnp.float32)
    if bf16_operands:
        # Optional (mainly v5e): bf16 MXU operands, f32 accumulation.
        x = x.astype(jnp.bfloat16)
        w = w.astype(jnp.bfloat16)

    Bb = _choose_block_b(B, in_features, out_pad, max_block_b)
    grid = (pl.cdiv(B, Bb),)                                # ragged tail masked

    out = pl.pallas_call(
        _matmul_kernel,
        out_shape=jax.ShapeDtypeStruct((B, out_pad), jnp.float32),
        grid=grid,
        in_specs=[
            pl.BlockSpec((Bb, in_features), lambda b: (b, 0)),
            pl.BlockSpec((in_features, out_pad), lambda b: (0, 0)),  # invariant
        ],
        out_specs=pl.BlockSpec((Bb, out_pad), lambda b: (b, 0)),
        compiler_params=pltpu.CompilerParams(
            dimension_semantics=("parallel",)),
    )(x, w)

    if out_pad != out_width:
        out = out[:, :out_width]
    return out


def reference_forward(x, theta, scale=1.0):
    """Pure-JAX mirror of the PyTorch PhaseShifter.forward."""
    c = jnp.cos(theta) / scale
    s = jnp.sin(theta) / scale
    w = jnp.concatenate(
        [jnp.concatenate([c, -s], axis=1),
         jnp.concatenate([s, c], axis=1)], axis=0)
    return jnp.dot(x, w, precision=jax.lax.Precision.HIGHEST)


if __name__ == "__main__":
    # Shapes consistent with the module: in_features = 2 * n_antennas.
    in_features, out_features, scale = 128, 128, 2.0
    in_dim = in_features // 2

    key = jax.random.PRNGKey(0)
    k_theta, k_x1, k_x2 = jax.random.split(key, 3)
    theta = jax.random.uniform(k_theta, (in_dim, out_features), jnp.float32,
                               0.0, 2.0 * jnp.pi)

    # Case 1: small batch -> single full-batch grid step.
    x_small = jax.random.normal(k_x1, (16, in_features), jnp.float32)
    out_small = jax.block_until_ready(
        phase_shifter_forward(x_small, theta, scale))
    ref_small = reference_forward(x_small, theta, scale)
    assert out_small.shape == (16, 2 * out_features)
    assert jnp.allclose(out_small, ref_small, atol=5e-3, rtol=5e-3), \
        float(jnp.max(jnp.abs(out_small - ref_small)))

    # Case 2: larger ragged batch -> 2 parallel grid steps, masked tail block.
    x_big = jax.random.normal(k_x2, (260, in_features), jnp.float32)
    out_big = jax.block_until_ready(
        phase_shifter_forward(x_big, theta, scale))
    ref_big = reference_forward(x_big, theta, scale)
    assert out_big.shape == (260, 2 * out_features)
    assert jnp.allclose(out_big, ref_big, atol=5e-3, rtol=5e-3), \
        float(jnp.max(jnp.abs(out_big - ref_big)))

    print("KERNEL_OK")
</pallas_src>

<mosaic_0001>
module attributes {stable_mosaic.version = 11 : i64} {
  func.func @_matmul_kernel(%arg0: i32, %arg1: memref<16x128xf32, #tpu.memory_space<vmem>>, %arg2: memref<128x256xf32, #tpu.memory_space<vmem>>, %arg3: memref<16x256xf32, #tpu.memory_space<vmem>>) attributes {dimension_semantics = [#tpu.dimension_semantics<parallel>], iteration_bounds = array<i64: 1>, scalar_prefetch = 0 : i64, scratch_operands = 0 : i64, tpu.core_type = #tpu.core_type<tc>, window_params = [{transform_indices = @transform_0, window_bounds = array<i64: 16, 128>}, {pipeline_mode = #tpu.pipeline_mode<synchronous>, transform_indices = @transform_1, window_bounds = array<i64: 128, 256>}, {transform_indices = @transform_2, window_bounds = array<i64: 16, 256>}]} {
    %c0 = arith.constant 0 : index
    %c0_0 = arith.constant 0 : index
    %0 = vector.load %arg1[%c0, %c0_0] : memref<16x128xf32, #tpu.memory_space<vmem>>, vector<16x128xf32>
    %c0_1 = arith.constant 0 : index
    %c0_2 = arith.constant 0 : index
    %1 = vector.load %arg2[%c0_1, %c0_2] : memref<128x256xf32, #tpu.memory_space<vmem>>, vector<128x256xf32>
    %cst = arith.constant dense<0.000000e+00> : vector<16x256xf32>
    %2 = tpu.matmul %0, %1, %cst {dimension_numbers = #tpu.dot_dimension_numbers<[1], [0], [0], [1], [0, 0, 1, 1], [], []>} : vector<16x128xf32>, vector<128x256xf32>, vector<16x256xf32> -> vector<16x256xf32>
    %c0_3 = arith.constant 0 : index
    %c0_4 = arith.constant 0 : index
    %3 = vector.load %arg3[%c0_3, %c0_4] : memref<16x256xf32, #tpu.memory_space<vmem>>, vector<16x256xf32>
    tpu.vector_store %arg3[%c0_3, %c0_4], %2 {strides = array<i32>} : memref<16x256xf32, #tpu.memory_space<vmem>>, vector<16x256xf32>,
    return
  }
  func.func @transform_0(%arg0: i32) -> (i32, i32) {
    %c0_i32 = arith.constant 0 : i32
    %c0_i32_0 = arith.constant 0 : i32
    return %arg0, %c0_i32 : i32, i32
  }
  func.func @transform_1(%arg0: i32) -> (i32, i32) {
    %c0_i32 = arith.constant 0 : i32
    %c0_i32_0 = arith.constant 0 : i32
    %c0_i32_1 = arith.constant 0 : i32
    return %c0_i32, %c0_i32_0 : i32, i32
  }
  func.func @transform_2(%arg0: i32) -> (i32, i32) {
    %c0_i32 = arith.constant 0 : i32
    %c0_i32_0 = arith.constant 0 : i32
    return %arg0, %c0_i32 : i32, i32
  }
}

</mosaic_0001>

<bundles_post_ra>
// kernel: tpu_custom_call.1
= control target key start
LH: loop header
LB: loop body
LE: loop exit
PB: predicated region body
PF: predicated region fallthrough
CT: control target
= control target key end

     0   :  { %7 = vsyncpa [#allocation3], 0  ;;  %s366_s0 = inlined_call_operand.hbm [shape: f32[16,128], index: 0, kind: input, shape index: {}]   ;;  %s367_s1 = inlined_call_operand.hbm [shape: f32[128,256], index: 1, kind: input, shape index: {}]   ;;  %s368_s2 = inlined_call_operand.hbm [shape: f32[16,256], index: 2, kind: output, shape index: {}]  }
   0x1   :  { %8 = vsyncpa [#allocation6], 0 }
   0x2   :  { %9 = vsyncpa [#allocation4], 0  ;;  %s301_s9 = smov [#allocation2]   ;;  %s229_s13 = scalar_lea.hbm %s366_s0, 256 }
   0x3   :  { %s15_s10 = sshll.u32 %s301_s9, 4  ;;  %p230_p0 = scmp.ne.s32.totalorder %s366_s0, %s229_s13  ;;  %s16_s10 = int_to_ptr.vmem [resolvable:$true] %s15_s10 }
   0x4   :  { %p233_p1 = scmp.lt.u32.totalorder %s229_s13, %s366_s0 }
   0x6   :  { %p235_p2 = pnand %p233_p1, %p230_p0 }
   0x8   :  { %238 = shalt.err (!%p235_p2)
}
   0x9   :  { %s239_s18 = scalar_lea.vmem %s16_s10, 256  ;;  %p244_p4 = scmp.lt.s32.totalorder %s16_s10, %s16_s10 }
   0xa   :  { %p240_p3 = scmp.ne.s32.totalorder %s16_s10, %s239_s18  ;;  %p245_p5 = scmp.lt.s32.totalorder %s239_s18, %s239_s18 }
   0xc   :  { %p246_p6 = por %p245_p5, %p244_p4 }
   0xe   :  { %p247_p7 = pnand %p246_p6, %p240_p3 }
  0x10   :  { %250 = shalt.err (!%p247_p7)
}
  0x11   :  { %s302_s19 = smov 128   ;;  %s303_s20 = smov 8  }
  0x12   :  { %21 = dma.hbm_to_vmem [thread:$0]  %s366_s0, 256, %s16_s10, [#allocation3], %s302_s19, %s302_s19, %s303_s20  }
  0x13   :  { %s304_s23 = smov [#allocation5]   ;;  %s251_s27 = scalar_lea.hbm %s367_s1, 4096 }
  0x14   :  { %s27_s24 = sshll.u32 %s304_s23, 4  ;;  %p252_p8 = scmp.ne.s32.totalorder %s367_s1, %s251_s27  ;;  %s28_s24 = int_to_ptr.vmem [resolvable:$true] %s27_s24 }
  0x15   :  { %p255_p9 = scmp.lt.u32.totalorder %s251_s27, %s367_s1 }
  0x17   :  { %p257_p10 = pnand %p255_p9, %p252_p8 }
  0x19   :  { %260 = shalt.err (!%p257_p10)
}
  0x1a   :  { %s261_s4 = scalar_lea.vmem %s28_s24, 4096  ;;  %p266_p12 = scmp.lt.s32.totalorder %s28_s24, %s28_s24 }
  0x1b   :  { %p262_p11 = scmp.ne.s32.totalorder %s28_s24, %s261_s4  ;;  %p267_p13 = scmp.lt.s32.totalorder %s261_s4, %s261_s4 }
  0x1d   :  { %p268_p0 = por %p267_p13, %p266_p12 }
  0x1f   :  { %p269_p1 = pnand %p268_p0, %p262_p11 }
  0x21   :  { %272 = shalt.err (!%p269_p1)
}
  0x22   :  { %s305_s0 = smov 256   ;;  %s306_s5 = smov 16  }
  0x23   :  { %33 = dma.hbm_to_vmem [thread:$0]  %s367_s1, 4096, %s28_s24, [#allocation6], %s305_s0, %s305_s0, %s306_s5  }
  0x24   :  { %295 = dma.done.wait [#allocation3], 256  }
  0x25   :  { %296 = vsyncadd [#allocation3], 4294967040 }
  0x26   :  { %297 = dma.done.wait [#allocation6], 4096  }
  0x27   :  { %298 = vsyncadd [#allocation6], 4294963200  ;;  %v307_v0 = vmov 0.0   ;;  %v43_v1 = vld [vmem:[#allocation5 + $0x8] sm:$0xff]  ;;  %v45_v2 = vld [vmem:[#allocation5 + $0x18] sm:$0xff]  ;;  %s308_s1 = smov [#allocation7]  }
  0x28   :  { %138 = vmatprep.mubr.f32.mxu0 %v307_v0  ;;  %144 = vmatprep.mubr.f32.mxu1 %v307_v0  ;;  %v42_v3 = vld [vmem:[#allocation5] sm:$0xff]  ;;  %v173_v4 = vpack.c.bf16 %v45_v2, %v43_v1  ;;  %v44_v5 = vld [vmem:[#allocation5 + $0x10] sm:$0xff]  ;;  %v47_v6 = vld [vmem:[#allocation5 + $0x28] sm:$0xff]  ;;  %s160_s8 = sshll.u32 %s308_s1, 4  ;;  %s161_s8 = int_to_ptr.vmem [resolvable:$true] %s160_s8 }
  0x29   :  { %v49_v7 = vld [vmem:[#allocation5 + $0x38] sm:$0xff]  ;;  %v175_v8 = vpack.c.bf16 %v44_v5, %v42_v3  ;;  %v46_v10 = vld [vmem:[#allocation5 + $0x20] sm:$0xff]  ;;  %v48_v11 = vld [vmem:[#allocation5 + $0x30] sm:$0xff]  ;;  %s273_s9 = scalar_lea.vmem %s161_s8, 512  ;;  %p278_p3 = scmp.lt.s32.totalorder %s161_s8, %s161_s8 }
  0x2a   :  { %v177_v9 = vpack.c.bf16 %v49_v7, %v47_v6  ;;  %v51_v12 = vld [vmem:[#allocation5 + $0x48] sm:$0xff]  ;;  %174 = vmatprep.subr.bf16.mxu0 %v173_v4  ;;  %205 = vmatprep.subr.bf16.mxu1 %v173_v4  ;;  %v53_v13 = vld [vmem:[#allocation5 + $0x58] sm:$0xff]  ;;  %v179_v14 = vpack.c.bf16 %v48_v11, %v46_v10  ;;  %v50_v16 = vld [vmem:[#allocation5 + $0x40] sm:$0xff]  ;;  %p274_p2 = scmp.ne.s32.totalorder %s161_s8, %s273_s9  ;;  %p279_p4 = scmp.lt.s32.totalorder %s273_s9, %s273_s9 }
  0x2b   :  { %176 = vmatpush1.bf16.msra.mxu0 %v175_v8  ;;  %213 = vmatpush1.bf16.msra.mxu1 %v175_v8  ;;  %v181_v15 = vpack.c.bf16 %v53_v13, %v51_v12  ;;  %v52_v17 = vld [vmem:[#allocation5 + $0x50] sm:$0xff]  ;;  %v55_v18 = vld [vmem:[#allocation5 + $0x68] sm:$0xff]  ;;  %v57_v19 = vld [vmem:[#allocation5 + $0x78] sm:$0xff] }
  0x2c   :  { %178 = vmatprep.subr.bf16.mxu0 %v177_v9  ;;  %206 = vmatprep.subr.bf16.mxu1 %v177_v9  ;;  %v183_v20 = vpack.c.bf16 %v52_v17, %v50_v16  ;;  %v185_v21 = vpack.c.bf16 %v57_v19, %v55_v18  ;;  %v54_v22 = vld [vmem:[#allocation5 + $0x60] sm:$0xff]  ;;  %v56_v23 = vld [vmem:[#allocation5 + $0x70] sm:$0xff]  ;;  %v59_v24 = vld [vmem:[#allocation5 + $0x88] sm:$0xff]  ;;  %p280_p5 = por %p279_p4, %p278_p3 }
  0x2d   :  { %v61_v25 = vld [vmem:[#allocation5 + $0x98] sm:$0xff]  ;;  %v187_v26 = vpack.c.bf16 %v56_v23, %v54_v22  ;;  %v58_v28 = vld [vmem:[#allocation5 + $0x80] sm:$0xff]  ;;  %v60_v29 = vld [vmem:[#allocation5 + $0x90] sm:$0xff] }
  0x2e   :  { %v189_v27 = vpack.c.bf16 %v61_v25, %v59_v24  ;;  %v63_v30 = vld [vmem:[#allocation5 + $0xa8] sm:$0xff]  ;;  %v65_v31 = vld [vmem:[#allocation5 + $0xb8] sm:$0xff]  ;;  %v191_v32 = vpack.c.bf16 %v60_v29, %v58_v28  ;;  %v62_v34 = vld [vmem:[#allocation5 + $0xa0] sm:$0xff]  ;;  %p281_p6 = pnand %p280_p5, %p274_p2 }
  0x2f   :  { %180 = vmatpush1.bf16.msra.mxu0 %v179_v14  ;;  %214 = vmatpush1.bf16.msra.mxu1 %v179_v14  ;;  %v193_v33 = vpack.c.bf16 %v65_v31, %v63_v30  ;;  %v64_v35 = vld [vmem:[#allocation5 + $0xb0] sm:$0xff]  ;;  %v67_v36 = vld [vmem:[#allocation5 + $0xc8] sm:$0xff]  ;;  %v69_v37 = vld [vmem:[#allocation5 + $0xd8] sm:$0xff] }
  0x30   :  { %182 = vmatprep.subr.bf16.mxu0 %v181_v15  ;;  %207 = vmatprep.subr.bf16.mxu1 %v181_v15  ;;  %v195_v38 = vpack.c.bf16 %v64_v35, %v62_v34  ;;  %v197_v39 = vpack.c.bf16 %v69_v37, %v67_v36  ;;  %v66_v40 = vld [vmem:[#allocation5 + $0xc0] sm:$0xff]  ;;  %v68_v41 = vld [vmem:[#allocation5 + $0xd0] sm:$0xff]  ;;  %v71_v42 = vld [vmem:[#allocation5 + $0xe8] sm:$0xff] }
  0x31   :  { %v73_v43 = vld [vmem:[#allocation5 + $0xf8] sm:$0xff]  ;;  %v199_v44 = vpack.c.bf16 %v68_v41, %v66_v40  ;;  %v70_v46 = vld [vmem:[#allocation5 + $0xe0] sm:$0xff]  ;;  %v72_v47 = vld [vmem:[#allocation5 + $0xf0] sm:$0xff] }
  0x32   :  { %v201_v45 = vpack.c.bf16 %v73_v43, %v71_v42  ;;  %v203_v48 = vpack.c.bf16 %v72_v47, %v70_v46  ;;  %v40_v49 = vld [vmem:[#allocation2] sm:$0xff]  ;;  %v41_v50 = vld [vmem:[#allocation2 + $0x8] sm:$0xff] }
  0x33   :  { %184 = vmatpush1.bf16.msra.mxu0 %v183_v20  ;;  %215 = vmatpush1.bf16.msra.mxu1 %v183_v20 }
  0x34   :  { %186 = vmatprep.subr.bf16.mxu0 %v185_v21  ;;  %208 = vmatprep.subr.bf16.mxu1 %v185_v21 }
  0x37   :  { %188 = vmatpush1.bf16.msra.mxu0 %v187_v26  ;;  %216 = vmatpush1.bf16.msra.mxu1 %v187_v26 }
  0x38   :  { %190 = vmatprep.subr.bf16.mxu0 %v189_v27  ;;  %209 = vmatprep.subr.bf16.mxu1 %v189_v27 }
  0x3b   :  { %192 = vmatpush1.bf16.msra.mxu0 %v191_v32  ;;  %217 = vmatpush1.bf16.msra.mxu1 %v191_v32 }
  0x3c   :  { %194 = vmatprep.subr.bf16.mxu0 %v193_v33  ;;  %210 = vmatprep.subr.bf16.mxu1 %v193_v33 }
  0x3f   :  { %196 = vmatpush1.bf16.msra.mxu0 %v195_v38  ;;  %218 = vmatpush1.bf16.msra.mxu1 %v195_v38 }
  0x40   :  { %198 = vmatprep.subr.bf16.mxu0 %v197_v39  ;;  %211 = vmatprep.subr.bf16.mxu1 %v197_v39 }
  0x43   :  { %200 = vmatpush1.bf16.msra.mxu0 %v199_v44  ;;  %219 = vmatpush1.bf16.msra.mxu1 %v199_v44 }
  0x44   :  { %202 = vmatprep.subr.bf16.mxu0 %v201_v45  ;;  %212 = vmatprep.subr.bf16.mxu1 %v201_v45 }
  0x47   :  { %204 = vmatpush1.bf16.msra.mxu0 %v203_v48  ;;  %220 = vmatpush1.bf16.msra.mxu1 %v203_v48 }
  0x4a   :  { %139 = vmatmul.mubr.f32.vlgmr.msra.gmra.mrb[0].mxu0 %v40_v49  ;;  %145 = vmatmul.mubr.f32.vlgmr.msra.gmra.mrb[0].mxu1 %v41_v50 }
 0x11d   :  { %v140_v51 = vpop.f32.mrb[0].mxu0  ;;  %v146_v52 = vpop.f32.mrb[0].mxu1 }
 0x11e   :  { %151 = vst [vmem:[#allocation7] sm:$0xff] %v140_v51  ;;  %153 = vst [vmem:[#allocation7 + $0x10] sm:$0xff] %v146_v52  ;;  %v142_v53 = vpop.f32.mrb[1].mxu0  ;;  %v148_v54 = vpop.f32.mrb[1].mxu1 }
 0x11f   :  { %152 = vst [vmem:[#allocation7 + $0x8] sm:$0xff] %v142_v53  ;;  %154 = vst [vmem:[#allocation7 + $0x18] sm:$0xff] %v148_v54 }
 0x120   :  { %284 = shalt.err (!%p281_p6)
}
 0x121   :  { %s285_s12 = scalar_lea.hbm %s368_s2, 512 }
 0x122   :  { %p286_p7 = scmp.ne.s32.totalorder %s368_s2, %s285_s12  ;;  %p289_p8 = scmp.lt.u32.totalorder %s285_s12, %s368_s2 }
 0x124   :  { %p291_p9 = pnand %p289_p8, %p286_p7 }
 0x126   :  { %294 = shalt.err (!%p291_p9)
}
 0x127   :  { %166 = dma.vmem_to_hbm [thread:$0]  %s161_s8, 512, %s368_s2, [#allocation4], %s305_s0, %s305_s0, %s306_s5  }
 0x128   :  { %299 = dma.done.wait [#allocation4], 512  }
 0x129   :  { %300 = vsyncadd [#allocation4], 4294966784 }
 0x12a   :  { %170 = vsyncpa [#allocation3], 1 }
 0x12b   :  { %171 = vsyncpa [#allocation6], 1 }
 0x12c   :  { %172 = vsyncpa [#allocation4], 1 }

</bundles_post_ra>
